<compile_context>
chip_gen: v5e
topology: v5e:2x2
jax: 0.10.0
libtpu: 0.0.40
codegen_flags: <defaults>
</compile_context>

<pallas_src>
import functools

import jax
import jax.numpy as jnp
from jax.experimental import pallas as pl
from jax.experimental.pallas import tpu as pltpu


def _round_up(n, m):
    return ((n + m - 1) // m) * m


def mlp3_kernel(x_ref,
                w1_ref, b1_ref,
                w2_ref, b2_ref,
                w3_ref, b3_ref,
                w4_ref, b4_ref,
                o_ref):
    """Fused 4-layer MLP.

    Layer 1 runs in f32 (K = in_dim is tiny -> negligible MXU cost, full
    accuracy, no input cast).  Layers 2-4 use bf16 MXU operands with f32
    accumulation; bias-add + ReLU are f32 VPU work, the bf16 cast for the next
    matmul is fused into the activation.
    """
    h = jnp.dot(x_ref[...], w1_ref[...], preferred_element_type=jnp.float32)
    h = jnp.maximum(h + b1_ref[...], 0.0).astype(jnp.bfloat16)

    h = jnp.dot(h, w2_ref[...], preferred_element_type=jnp.float32)
    h = jnp.maximum(h + b2_ref[...], 0.0).astype(jnp.bfloat16)

    h = jnp.dot(h, w3_ref[...], preferred_element_type=jnp.float32)
    h = jnp.maximum(h + b3_ref[...], 0.0).astype(jnp.bfloat16)

    y = jnp.dot(h, w4_ref[...], preferred_element_type=jnp.float32)
    o_ref[...] = (y + b4_ref[...]).astype(o_ref.dtype)


def prepare_params(params):
    """One-time weight prep: layer-1 stays f32, layers 2-4 weights -> bf16.

    Call once (outside the hot loop) and reuse the result for every forward.
    """
    return {
        "w1": params["w1"].astype(jnp.float32),
        "b1": params["b1"].astype(jnp.float32),
        "w2": params["w2"].astype(jnp.bfloat16),
        "b2": params["b2"].astype(jnp.float32),
        "w3": params["w3"].astype(jnp.bfloat16),
        "b3": params["b3"].astype(jnp.float32),
        "w4": params["w4"].astype(jnp.bfloat16),
        "b4": params["b4"].astype(jnp.float32),
    }


@functools.partial(jax.jit, static_argnames=("batch_tile",))
def mlp3_forward(x, params, *, batch_tile=1024):
    """x: (B, in_dim) float32.  params: output of prepare_params()."""
    B, in_dim = x.shape
    h1 = params["w1"].shape[1]          # 256
    h2 = params["w2"].shape[1]          # 128
    h3 = params["w3"].shape[1]          # 64
    out_dim = params["w4"].shape[1]

    # ---- batch tiling --------------------------------------------------
    # Cap to keep intermediates well inside VMEM on all generations (v7x has
    # only 64 MiB physical); round to sublane multiple; shrink to the batch.
    bt = max(8, min(batch_tile, 2048))
    bt = _round_up(bt, 8)
    bt = min(bt, _round_up(B, 8))
    # Guarantee >= 2 grid steps for v7x megacore whenever the batch is
    # non-trivial (harmless on v5e/v6e).
    if B >= 16:
        while bt > 8 and _round_up(B, bt) // bt < 2:
            bt = _round_up(bt // 2, 8)
    B_pad = _round_up(B, bt)
    grid = (B_pad // bt,)

    # Only the batch axis is padded (cheap, no lane inflation); feature dims
    # stay at their natural sizes.
    x_p = jnp.pad(x, ((0, B_pad - B), (0, 0))) if B_pad != B else x

    # Weights/biases: constant (0, 0) block index -> DMA'd once and kept
    # resident in VMEM across all grid iterations.
    def w_spec(arr):
        return pl.BlockSpec(arr.shape, lambda i: (0, 0))

    flops = 2 * B_pad * (in_dim * h1 + h1 * h2 + h2 * h3 + h3 * out_dim)
    bytes_accessed = (
        B_pad * in_dim * 4 + B_pad * out_dim * 4
        + params["w1"].size * 4
        + (params["w2"].size + params["w3"].size + params["w4"].size) * 2
        + (params["b1"].size + params["b2"].size
           + params["b3"].size + params["b4"].size) * 4)

    out_padded = pl.pallas_call(
        mlp3_kernel,
        out_shape=jax.ShapeDtypeStruct((B_pad, out_dim), jnp.float32),
        grid_spec=pltpu.PrefetchScalarGridSpec(
            num_scalar_prefetch=0,
            grid=grid,
            in_specs=[
                pl.BlockSpec((bt, in_dim), lambda i: (i, 0)),   # x tile
                w_spec(params["w1"]), w_spec(params["b1"]),
                w_spec(params["w2"]), w_spec(params["b2"]),
                w_spec(params["w3"]), w_spec(params["b3"]),
                w_spec(params["w4"]), w_spec(params["b4"]),
            ],
            out_specs=pl.BlockSpec((bt, out_dim), lambda i: (i, 0)),
        ),
        compiler_params=pltpu.CompilerParams(
            dimension_semantics=("parallel",),
        ),
        cost_estimate=pl.CostEstimate(
            flops=flops, transcendentals=0, bytes_accessed=bytes_accessed),
    )(
        x_p,
        params["w1"], params["b1"],
        params["w2"], params["b2"],
        params["w3"], params["b3"],
        params["w4"], params["b4"],
    )

    # Strip only batch padding (feature dims were never padded).
    return out_padded[:B] if B_pad != B else out_padded


def init_mlp3_params(key, in_dim, out_dim):
    """Deterministic init mirroring nn.Linear's U(-1/sqrt(fan_in), +1/sqrt(fan_in)).

    Weights stored transposed to (fan_in, fan_out); biases as (1, fan_out)."""
    dims = [in_dim, 256, 128, 64, out_dim]
    params = {}
    for layer in range(4):
        fan_in, fan_out = dims[layer], dims[layer + 1]
        key, kw, kb = jax.random.split(key, 3)
        bound = 1.0 / jnp.sqrt(jnp.float32(fan_in))
        params[f"w{layer + 1}"] = jax.random.uniform(
            kw, (fan_in, fan_out), jnp.float32, -bound, bound)
        params[f"b{layer + 1}"] = jax.random.uniform(
            kb, (1, fan_out), jnp.float32, -bound, bound)
    return params


def mlp3_reference(x, params):
    """Plain-JAX f32 reference for correctness checking."""
    h = jnp.maximum(x @ params["w1"] + params["b1"], 0.0)
    h = jnp.maximum(h @ params["w2"] + params["b2"], 0.0)
    h = jnp.maximum(h @ params["w3"] + params["b3"], 0.0)
    return h @ params["w4"] + params["b4"]


if __name__ == "__main__":
    # Crop-recommendation-style shapes: 8 input features, 16 output classes.
    # B = 300 exercises batch padding and a 2-step grid (v7x megacore).
    batch, in_dim, out_dim = 300, 8, 16

    key = jax.random.PRNGKey(0)
    key, kx = jax.random.split(key)
    x = jax.random.normal(kx, (batch, in_dim), jnp.float32)
    params_f32 = init_mlp3_params(key, in_dim, out_dim)

    params = prepare_params(params_f32)     # one-time cast, reused every call
    out = mlp3_forward(x, params)           # default batch_tile=1024
    out = jax.block_until_ready(out)

    ref = mlp3_reference(x, params_f32)
    assert out.shape == (batch, out_dim)
    # Layers 2-4 use bf16 MXU operands vs the f32 reference -> loose tolerance.
    assert jnp.allclose(out, ref, atol=5e-2, rtol=5e-2), "mismatch vs reference"

    print("KERNEL_OK")
</pallas_src>

<mosaic_0001>
module attributes {stable_mosaic.version = 11 : i64} {
  func.func @mlp3_kernel(%arg0: i32, %arg1: memref<152x8xf32, #tpu.memory_space<vmem>>, %arg2: memref<8x256xf32, #tpu.memory_space<vmem>>, %arg3: memref<1x256xf32, #tpu.memory_space<vmem>>, %arg4: memref<256x128xbf16, #tpu.memory_space<vmem>>, %arg5: memref<1x128xf32, #tpu.memory_space<vmem>>, %arg6: memref<128x64xbf16, #tpu.memory_space<vmem>>, %arg7: memref<1x64xf32, #tpu.memory_space<vmem>>, %arg8: memref<64x16xbf16, #tpu.memory_space<vmem>>, %arg9: memref<1x16xf32, #tpu.memory_space<vmem>>, %arg10: memref<152x16xf32, #tpu.memory_space<vmem>>) attributes {dimension_semantics = [#tpu.dimension_semantics<parallel>], iteration_bounds = array<i64: 2>, scalar_prefetch = 0 : i64, scratch_operands = 0 : i64, tpu.core_type = #tpu.core_type<tc>, window_params = [{transform_indices = @transform_0, window_bounds = array<i64: 152, 8>}, {pipeline_mode = #tpu.pipeline_mode<synchronous>, transform_indices = @transform_1, window_bounds = array<i64: 8, 256>}, {pipeline_mode = #tpu.pipeline_mode<synchronous>, transform_indices = @transform_2, window_bounds = array<i64: 1, 256>}, {pipeline_mode = #tpu.pipeline_mode<synchronous>, transform_indices = @transform_3, window_bounds = array<i64: 256, 128>}, {pipeline_mode = #tpu.pipeline_mode<synchronous>, transform_indices = @transform_4, window_bounds = array<i64: 1, 128>}, {pipeline_mode = #tpu.pipeline_mode<synchronous>, transform_indices = @transform_5, window_bounds = array<i64: 128, 64>}, {pipeline_mode = #tpu.pipeline_mode<synchronous>, transform_indices = @transform_6, window_bounds = array<i64: 1, 64>}, {pipeline_mode = #tpu.pipeline_mode<synchronous>, transform_indices = @transform_7, window_bounds = array<i64: 64, 16>}, {pipeline_mode = #tpu.pipeline_mode<synchronous>, transform_indices = @transform_8, window_bounds = array<i64: 1, 16>}, {transform_indices = @transform_9, window_bounds = array<i64: 152, 16>}]} {
    %c0 = arith.constant 0 : index
    %c0_0 = arith.constant 0 : index
    %0 = vector.load %arg1[%c0, %c0_0] : memref<152x8xf32, #tpu.memory_space<vmem>>, vector<152x8xf32>
    %c0_1 = arith.constant 0 : index
    %c0_2 = arith.constant 0 : index
    %1 = vector.load %arg2[%c0_1, %c0_2] : memref<8x256xf32, #tpu.memory_space<vmem>>, vector<8x256xf32>
    %cst = arith.constant dense<0.000000e+00> : vector<152x256xf32>
    %2 = tpu.matmul %0, %1, %cst {dimension_numbers = #tpu.dot_dimension_numbers<[1], [0], [0], [1], [0, 0, 1, 1], [], []>} : vector<152x8xf32>, vector<8x256xf32>, vector<152x256xf32> -> vector<152x256xf32>
    %c0_3 = arith.constant 0 : index
    %c0_4 = arith.constant 0 : index
    %3 = vector.load %arg3[%c0_3, %c0_4] : memref<1x256xf32, #tpu.memory_space<vmem>>, vector<1x256xf32>
    %4 = vector.broadcast %3 : vector<1x256xf32> to vector<152x256xf32>
    %5 = arith.addf %2, %4 : vector<152x256xf32>
    %cst_5 = arith.constant 0.000000e+00 : f32
    %6 = vector.broadcast %cst_5 : f32 to vector<152x256xf32>
    %7 = arith.maximumf %5, %6 : vector<152x256xf32>
    %8 = arith.truncf %7 : vector<152x256xf32> to vector<152x256xbf16>
    %c0_6 = arith.constant 0 : index
    %c0_7 = arith.constant 0 : index
    %9 = vector.load %arg4[%c0_6, %c0_7] : memref<256x128xbf16, #tpu.memory_space<vmem>>, vector<256x128xbf16>
    %cst_8 = arith.constant dense<0.000000e+00> : vector<152x128xf32>
    %10 = tpu.matmul %8, %9, %cst_8 {dimension_numbers = #tpu.dot_dimension_numbers<[1], [0], [0], [1], [0, 0, 1, 1], [], []>} : vector<152x256xbf16>, vector<256x128xbf16>, vector<152x128xf32> -> vector<152x128xf32>
    %c0_9 = arith.constant 0 : index
    %c0_10 = arith.constant 0 : index
    %11 = vector.load %arg5[%c0_9, %c0_10] : memref<1x128xf32, #tpu.memory_space<vmem>>, vector<1x128xf32>
    %12 = vector.broadcast %11 : vector<1x128xf32> to vector<152x128xf32>
    %13 = arith.addf %10, %12 : vector<152x128xf32>
    %cst_11 = arith.constant 0.000000e+00 : f32
    %14 = vector.broadcast %cst_11 : f32 to vector<152x128xf32>
    %15 = arith.maximumf %13, %14 : vector<152x128xf32>
    %16 = arith.truncf %15 : vector<152x128xf32> to vector<152x128xbf16>
    %c0_12 = arith.constant 0 : index
    %c0_13 = arith.constant 0 : index
    %17 = vector.load %arg6[%c0_12, %c0_13] : memref<128x64xbf16, #tpu.memory_space<vmem>>, vector<128x64xbf16>
    %cst_14 = arith.constant dense<0.000000e+00> : vector<152x64xf32>
    %18 = tpu.matmul %16, %17, %cst_14 {dimension_numbers = #tpu.dot_dimension_numbers<[1], [0], [0], [1], [0, 0, 1, 1], [], []>} : vector<152x128xbf16>, vector<128x64xbf16>, vector<152x64xf32> -> vector<152x64xf32>
    %c0_15 = arith.constant 0 : index
    %c0_16 = arith.constant 0 : index
    %19 = vector.load %arg7[%c0_15, %c0_16] : memref<1x64xf32, #tpu.memory_space<vmem>>, vector<1x64xf32>
    %20 = vector.broadcast %19 : vector<1x64xf32> to vector<152x64xf32>
    %21 = arith.addf %18, %20 : vector<152x64xf32>
    %cst_17 = arith.constant 0.000000e+00 : f32
    %22 = vector.broadcast %cst_17 : f32 to vector<152x64xf32>
    %23 = arith.maximumf %21, %22 : vector<152x64xf32>
    %24 = arith.truncf %23 : vector<152x64xf32> to vector<152x64xbf16>
    %c0_18 = arith.constant 0 : index
    %c0_19 = arith.constant 0 : index
    %25 = vector.load %arg8[%c0_18, %c0_19] : memref<64x16xbf16, #tpu.memory_space<vmem>>, vector<64x16xbf16>
    %cst_20 = arith.constant dense<0.000000e+00> : vector<152x16xf32>
    %26 = tpu.matmul %24, %25, %cst_20 {dimension_numbers = #tpu.dot_dimension_numbers<[1], [0], [0], [1], [0, 0, 1, 1], [], []>} : vector<152x64xbf16>, vector<64x16xbf16>, vector<152x16xf32> -> vector<152x16xf32>
    %c0_21 = arith.constant 0 : index
    %c0_22 = arith.constant 0 : index
    %27 = vector.load %arg9[%c0_21, %c0_22] : memref<1x16xf32, #tpu.memory_space<vmem>>, vector<1x16xf32>
    %28 = vector.broadcast %27 : vector<1x16xf32> to vector<152x16xf32>
    %29 = arith.addf %26, %28 : vector<152x16xf32>
    %c0_23 = arith.constant 0 : index
    %c0_24 = arith.constant 0 : index
    %30 = vector.load %arg10[%c0_23, %c0_24] : memref<152x16xf32, #tpu.memory_space<vmem>>, vector<152x16xf32>
    tpu.vector_store %arg10[%c0_23, %c0_24], %29 {strides = array<i32>} : memref<152x16xf32, #tpu.memory_space<vmem>>, vector<152x16xf32>,
    return
  }
  func.func @transform_0(%arg0: i32) -> (i32, i32) {
    %c0_i32 = arith.constant 0 : i32
    %c0_i32_0 = arith.constant 0 : i32
    return %arg0, %c0_i32 : i32, i32
  }
  func.func @transform_1(%arg0: i32) -> (i32, i32) {
    %c0_i32 = arith.constant 0 : i32
    %c0_i32_0 = arith.constant 0 : i32
    %c0_i32_1 = arith.constant 0 : i32
    return %c0_i32, %c0_i32_0 : i32, i32
  }
  func.func @transform_2(%arg0: i32) -> (i32, i32) {
    %c0_i32 = arith.constant 0 : i32
    %c0_i32_0 = arith.constant 0 : i32
    %c0_i32_1 = arith.constant 0 : i32
    return %c0_i32, %c0_i32_0 : i32, i32
  }
  func.func @transform_3(%arg0: i32) -> (i32, i32) {
    %c0_i32 = arith.constant 0 : i32
    %c0_i32_0 = arith.constant 0 : i32
    %c0_i32_1 = arith.constant 0 : i32
    return %c0_i32, %c0_i32_0 : i32, i32
  }
  func.func @transform_4(%arg0: i32) -> (i32, i32) {
    %c0_i32 = arith.constant 0 : i32
    %c0_i32_0 = arith.constant 0 : i32
    %c0_i32_1 = arith.constant 0 : i32
    return %c0_i32, %c0_i32_0 : i32, i32
  }
  func.func @transform_5(%arg0: i32) -> (i32, i32) {
    %c0_i32 = arith.constant 0 : i32
    %c0_i32_0 = arith.constant 0 : i32
    %c0_i32_1 = arith.constant 0 : i32
    return %c0_i32, %c0_i32_0 : i32, i32
  }
  func.func @transform_6(%arg0: i32) -> (i32, i32) {
    %c0_i32 = arith.constant 0 : i32
    %c0_i32_0 = arith.constant 0 : i32
    %c0_i32_1 = arith.constant 0 : i32
    return %c0_i32, %c0_i32_0 : i32, i32
  }
  func.func @transform_7(%arg0: i32) -> (i32, i32) {
    %c0_i32 = arith.constant 0 : i32
    %c0_i32_0 = arith.constant 0 : i32
    %c0_i32_1 = arith.constant 0 : i32
    return %c0_i32, %c0_i32_0 : i32, i32
  }
  func.func @transform_8(%arg0: i32) -> (i32, i32) {
    %c0_i32 = arith.constant 0 : i32
    %c0_i32_0 = arith.constant 0 : i32
    %c0_i32_1 = arith.constant 0 : i32
    return %c0_i32, %c0_i32_0 : i32, i32
  }
  func.func @transform_9(%arg0: i32) -> (i32, i32) {
    %c0_i32 = arith.constant 0 : i32
    %c0_i32_0 = arith.constant 0 : i32
    return %arg0, %c0_i32 : i32, i32
  }
}

</mosaic_0001>

<bundles_post_ra>
// kernel: mlp3_forward.1
= control target key start
LH: loop header
LB: loop body
LE: loop exit
PB: predicated region body
PF: predicated region fallthrough
CT: control target
= control target key end

     0   :  { %s1529_s30 = smov 0   ;;  %s1873_s0 = inlined_call_operand.vmem [shape: f32[304,8], index: 0, kind: input, shape index: {}]   ;;  %s1874_s1 = inlined_call_operand.vmem [shape: f32[8,256], index: 1, kind: input, shape index: {}]   ;;  %s1875_s2 = inlined_call_operand.vmem [shape: f32[1,256], index: 2, kind: input, shape index: {}]   ;;  %s1876_s3 = inlined_call_operand.vmem [shape: bf16[256,128], index: 3, kind: input, shape index: {}]   ;;  %s1877_s4 = inlined_call_operand.vmem [shape: f32[1,128], index: 4, kind: input, shape index: {}]   ;;  %s1878_s5 = inlined_call_operand.vmem [shape: bf16[128,64], index: 5, kind: input, shape index: {}]   ;;  %s1879_s6 = inlined_call_operand.vmem [shape: f32[1,64], index: 6, kind: input, shape index: {}]   ;;  %s1880_s7 = inlined_call_operand.vmem [shape: bf16[64,16], index: 7, kind: input, shape index: {}]   ;;  %s1881_s8 = inlined_call_operand.vmem [shape: f32[1,16], index: 8, kind: input, shape index: {}]   ;;  %s1882_s9 = inlined_call_operand.vmem [shape: f32[304,16], index: 9, kind: output, shape index: {}]  }
   0x1 LB: > { %s1261_s10 = sadd.s32 4294967295, %s1477_s30   ;;  %p1265_p0 = scmp.ge.s32.totalorder %s1477_s30, 1  ;;  %s1477_s30 = sphi %s1529_s30, %s19_s30  }
   0x2   : > { %p288_p1 = scmp.lt.s32.totalorder %s1477_s30, 3 }
   0x4   : > { %p289_p2 = pnand %p1265_p0, %p288_p1 }
   0x5   : > { %s324_s15 = smul.u32 (!%p289_p2), 19, %s1261_s10 }
   0x6   : > { %292 = sbr.rel (%p289_p2) target bundleno = 721 (0x2d1), region = 56 }
   0x7   : > { %p325_p3 = scmp.lt.s32.totalorder (!%p289_p2), %s324_s15, 37 }
   0xb   : > { %v356_v0 = vld [vmem:[%s1874_s1] sm:$0xff]  ;;  %v357_v1 = vld [vmem:[%s1874_s1 + $0x8] sm:$0xff]  ;;  %s1884_s15 = smov (!%p325_p3, %s324_s15), 37  ;;  %vm364_vm0 = vcmask 64512   ;;  %v1445_v9 = vld [vmem:[%s1876_s3 + $0x78] sm:$0xff]  ;;  %vm1096_vm1 = vcmask 523264  }
   0xc   : > { %437 = vmatpush.msra.mxu0 %v356_v0  ;;  %511 = vmatpush.msra.mxu1 %v357_v1  ;;  %s1266_s16 = sshll.u32 %s1884_s15, 3  ;;  %v1437_v12 = vld [vmem:[%s1876_s3 + $0x38] sm:$0xff]  ;;  %v1444_v13 = vld [vmem:[%s1876_s3 + $0x70] sm:$0xff]  ;;  %v1443_v17 = vld [vmem:[%s1876_s3 + $0x68] sm:$0xff]  ;;  %vm1185_vm2 = vcmask 130048  }
   0xd   : > { %1459 = vmatpush.msra.mxu3 %v357_v1  ;;  %1458 = vmatpush.msra.mxu2 %v356_v0  ;;  %s1551_s19 = scalar_lea.vmem %s1873_s0, %s1266_s16  ;;  %v1436_v16 = vld [vmem:[%s1876_s3 + $0x30] sm:$0xff]  ;;  %v1435_v18 = vld [vmem:[%s1876_s3 + $0x28] sm:$0xff]  ;;  %v1442_v19 = vld [vmem:[%s1876_s3 + $0x60] sm:$0xff]  ;;  %s1808_s13 = scalar_lea.vmem %s1882_s9, %s1266_s16 }
   0xe   : > { %v337_v2 = vld [vmem:[%s1551_s19] sm:$0xff]  ;;  %v338_v3 = vld [vmem:[%s1551_s19 + $0x8] sm:$0xff]  ;;  %v339_v4 = vld [vmem:[%s1551_s19 + $0x10] sm:$0xff] }
   0xf   : > { %1268 = vmatmul.msk.f32.vlgmr.msra.gmra.mxu0 %vm364_vm0, %v337_v2  ;;  %1287 = vmatmul.msk.f32.vlgmr.msra.gmra.mxu1 %vm364_vm0, %v337_v2  ;;  %v340_v5 = vld [vmem:[%s1551_s19 + $0x18] sm:$0xff]  ;;  %v1566_v6 = vld [vmem:[%s1551_s19 + $0x50] sm:$0xff]  ;;  %v341_v7 = vld [vmem:[%s1551_s19 + $0x20] sm:$0xff] }
  0x10   : > { %1297 = vmatmul.msk.f32.vlgmr.msra.gmra.mxu3 %vm364_vm0, %v1566_v6  ;;  %v348_v8 = vld [vmem:[%s1551_s19 + $0x58] sm:$0xff]  ;;  %v342_v10 = vld [vmem:[%s1551_s19 + $0x28] sm:$0xff]  ;;  %v349_v11 = vld [vmem:[%s1551_s19 + $0x60] sm:$0xff]  ;;  %760 = vmatpush.bf16.msrb.mxu2 %v1437_v12 }
  0x11   : > { %1279 = vmatmul.msk.f32.vlgmr.msra.gmra.mxu2 %vm364_vm0, %v348_v8  ;;  %818 = vmatpush.bf16.msrb.mxu3 %v1445_v9  ;;  %v343_v14 = vld [vmem:[%s1551_s19 + $0x30] sm:$0xff]  ;;  %v350_v15 = vld [vmem:[%s1551_s19 + $0x68] sm:$0xff]  ;;  %v344_v20 = vld [vmem:[%s1551_s19 + $0x38] sm:$0xff] }
  0x12   : > { %v351_v21 = vld [vmem:[%s1551_s19 + $0x70] sm:$0xff]  ;;  %v1434_v22 = vld [vmem:[%s1876_s3 + $0x20] sm:$0xff]  ;;  %v1441_v23 = vld [vmem:[%s1876_s3 + $0x58] sm:$0xff] }
  0x13   : > { %v1433_v24 = vld [vmem:[%s1876_s3 + $0x18] sm:$0xff]  ;;  %v1440_v25 = vld [vmem:[%s1876_s3 + $0x50] sm:$0xff]  ;;  %v345_v26 = vld [vmem:[%s1551_s19 + $0x40] sm:$0xff] }
  0x14   : > { %761 = vmatpush.bf16.msrb.mxu2 %v1436_v16  ;;  %v352_v27 = vld [vmem:[%s1551_s19 + $0x78] sm:$0xff]  ;;  %v1432_v28 = vld [vmem:[%s1876_s3 + $0x10] sm:$0xff]  ;;  %v1439_v29 = vld [vmem:[%s1876_s3 + $0x48] sm:$0xff] }
  0x15   : > { %819 = vmatpush.bf16.msrb.mxu3 %v1444_v13  ;;  %v1431_v30 = vld [vmem:[%s1876_s3 + $0x8] sm:$0xff]  ;;  %v353_v32 = vld [vmem:[%s1551_s19 + $0x80] sm:$0xff]  ;;  %v355_v34 = vld [vmem:[%s1551_s19 + $0x90] sm:$0xff] }
  0x16   : > { %v346_v31 = vld [vmem:[%s1551_s19 + $0x48] sm:$0xff]  ;;  %v1430_v35 = vld [vmem:[%s1876_s3] sm:$0xff]  ;;  %v1453_v16 = vld [vmem:[%s1878_s5 + $0x38] sm:$0xff] }
  0x17   : > { %1269 = vmatmul.msk.f32.gmra.mxu0 %vm364_vm0, %v338_v3  ;;  %1288 = vmatmul.msk.f32.gmra.mxu1 %vm364_vm0, %v338_v3  ;;  %v354_v33 = vld [vmem:[%s1551_s19 + $0x88] sm:$0xff]  ;;  %v1438_v36 = vld [vmem:[%s1876_s3 + $0x40] sm:$0xff] }
  0x18   : > { %1298 = vmatmul.msk.f32.gmra.mxu3 %vm364_vm0, %v348_v8  ;;  %762 = vmatpush.bf16.msrb.mxu2 %v1435_v18  ;;  %v358_v37 = vld [vmem:[%s1875_s2] sm:$0x3] }
  0x19   : > { %1280 = vmatmul.msk.f32.gmra.mxu2 %vm364_vm0, %v349_v11  ;;  %820 = vmatpush.bf16.msrb.mxu3 %v1443_v17  ;;  %v1665_v40 = vperm.slane %v358_v37, 0  ;;  %v1667_v41 = vperm.slane %v358_v37, 1 }
  0x1a   : > { %973 = vmatpush.bf16.msrb.mxu0 %v1453_v16 }
  0x1c   : > { %763 = vmatpush.bf16.msrb.mxu2 %v1434_v22 }
  0x1d   : > { %821 = vmatpush.bf16.msrb.mxu3 %v1442_v19 }
  0x1f   : > { %1270 = vmatmul.msk.f32.gmra.mxu0 %vm364_vm0, %v339_v4  ;;  %1289 = vmatmul.msk.f32.gmra.mxu1 %vm364_vm0, %v339_v4 }
  0x20   : > { %1299 = vmatmul.msk.f32.gmra.mxu3 %vm364_vm0, %v349_v11  ;;  %764 = vmatpush.bf16.msrb.mxu2 %v1433_v24 }
  0x21   : > { %1281 = vmatmul.msk.f32.gmra.mxu2 %vm364_vm0, %v350_v15  ;;  %822 = vmatpush.bf16.msrb.mxu3 %v1441_v23 }
  0x24   : > { %765 = vmatpush.bf16.msrb.mxu2 %v1432_v28 }
  0x25   : > { %823 = vmatpush.bf16.msrb.mxu3 %v1440_v25 }
  0x27   : > { %1271 = vmatmul.msk.f32.gmra.mxu0 %vm364_vm0, %v340_v5  ;;  %1290 = vmatmul.msk.f32.gmra.mxu1 %vm364_vm0, %v340_v5 }
  0x28   : > { %1300 = vmatmul.msk.f32.gmra.mxu3 %vm364_vm0, %v350_v15  ;;  %766 = vmatpush.bf16.msrb.mxu2 %v1431_v30 }
  0x29   : > { %1282 = vmatmul.msk.f32.gmra.mxu2 %vm364_vm0, %v351_v21  ;;  %824 = vmatpush.bf16.msrb.mxu3 %v1439_v29 }
  0x2c   : > { %767 = vmatpush.bf16.msrb.mxu2 %v1430_v35  ;;  %v1451_v35 = vld [vmem:[%s1878_s5 + $0x28] sm:$0xff] }
  0x2d   : > { %825 = vmatpush.bf16.msrb.mxu3 %v1438_v36 }
  0x2f   : > { %1272 = vmatmul.msk.f32.gmra.mxu0 %vm364_vm0, %v341_v7  ;;  %1291 = vmatmul.msk.f32.gmra.mxu1 %vm364_vm0, %v341_v7 }
  0x30   : > { %1301 = vmatmul.msk.f32.gmra.mxu3 %vm364_vm0, %v351_v21  ;;  %v1452_v21 = vld [vmem:[%s1878_s5 + $0x30] sm:$0xff] }
  0x31   : > { %1283 = vmatmul.msk.f32.gmra.mxu2 %vm364_vm0, %v352_v27  ;;  %974 = vmatpush.bf16.msrb.mxu0 %v1452_v21 }
  0x35   : > { %975 = vmatpush.bf16.msrb.mxu0 %v1451_v35 }
  0x37   : > { %1273 = vmatmul.msk.f32.gmra.mxu0 %vm364_vm0, %v342_v10  ;;  %1292 = vmatmul.msk.f32.gmra.mxu1 %vm364_vm0, %v342_v10 }
  0x38   : > { %1302 = vmatmul.msk.f32.gmra.mxu3 %vm364_vm0, %v352_v27 }
  0x39   : > { %1284 = vmatmul.msk.f32.gmra.mxu2 %vm364_vm0, %v353_v32 }
  0x3f   : > { %1274 = vmatmul.msk.f32.gmra.mxu0 %vm364_vm0, %v343_v14  ;;  %1293 = vmatmul.msk.f32.gmra.mxu1 %vm364_vm0, %v343_v14 }
  0x40   : > { %1303 = vmatmul.msk.f32.gmra.mxu3 %vm364_vm0, %v353_v32 }
  0x41   : > { %1285 = vmatmul.msk.f32.gmra.mxu2 %vm364_vm0, %v354_v33 }
  0x47   : > { %1275 = vmatmul.msk.f32.gmra.mxu0 %vm364_vm0, %v344_v20  ;;  %1294 = vmatmul.msk.f32.gmra.mxu1 %vm364_vm0, %v344_v20 }
  0x48   : > { %1304 = vmatmul.msk.f32.gmra.mxu3 %vm364_vm0, %v354_v33 }
  0x49   : > { %1286 = vmatmul.msk.f32.gmra.mxu2 %vm364_vm0, %v355_v34 }
  0x4f   : > { %1276 = vmatmul.msk.f32.gmra.mxu0 %vm364_vm0, %v345_v26  ;;  %1295 = vmatmul.msk.f32.gmra.mxu1 %vm364_vm0, %v345_v26 }
  0x50   : > { %1305 = vmatmul.msk.f32.gmra.mxu3 %vm364_vm0, %v355_v34 }
  0x57   : > { %1277 = vmatmul.msk.f32.gmra.mxu0 %vm364_vm0, %v346_v31  ;;  %1296 = vmatmul.msk.f32.gmra.mxu1 %vm364_vm0, %v346_v31 }
  0x5f   : > { %1278 = vmatmul.msk.f32.gmra.mxu0 %vm364_vm0, %v1566_v6 }
  0x8c   : > { %v439_v38 = vpop.f32.mrf.mxu0  ;;  %v513_v39 = vpop.f32.mrf.mxu1 }
  0x8d   : > { %v440_v42 = vadd.f32 %v439_v38, %v1665_v40  ;;  %v514_v43 = vadd.f32 %v513_v39, %v1667_v41  ;;  %v1450_v38 = vld [vmem:[%s1878_s5 + $0x20] sm:$0xff] }
  0x8e   : > { %976 = vmatpush.bf16.msrb.mxu0 %v1450_v38 }
  0x8f   : > { %v570_v48 = vmax.f32 %v440_v42, 0.0  ;;  %v571_v49 = vmax.f32 %v514_v43, 0.0 }
  0x93   : > { %v543_v28 = vpop.f32.mrf.mxu3 }
  0x94   : > { %v442_v44 = vpop.f32.mrf.mxu0  ;;  %v516_v45 = vpop.f32.mrf.mxu1 }
  0x95   : > { %v443_v46 = vadd.f32 %v442_v44, %v1665_v40  ;;  %v517_v47 = vadd.f32 %v516_v45, %v1667_v41  ;;  %v472_v39 = vpop.f32.mrf.mxu2 }
  0x97   : > { %v572_v50 = vmax.f32 %v443_v46, 0.0  ;;  %v573_v51 = vmax.f32 %v517_v47, 0.0 }
  0x99   : > { %v608_v52 = vpack.c.bf16 %v572_v50, %v570_v48  ;;  %v609_v53 = vpack.c.bf16 %v573_v51, %v571_v49 }
  0x9b   : > { %768 = vmatmul.bf16.vlgmr.msrb.gmra.mxu2 %v608_v52  ;;  %826 = vmatmul.bf16.vlgmr.msrb.gmra.mxu3 %v609_v53  ;;  %v546_v42 = vpop.f32.mrf.mxu3 }
  0x9c   : > { %v445_v54 = vpop.f32.mrf.mxu0  ;;  %v519_v55 = vpop.f32.mrf.mxu1 }
  0x9d   : > { %v446_v56 = vadd.f32 %v445_v54, %v1665_v40  ;;  %v520_v57 = vadd.f32 %v519_v55, %v1667_v41  ;;  %v475_v55 = vpop.f32.mrf.mxu2 }
  0x9f   : > { %v574_v62 = vmax.f32 %v446_v56, 0.0  ;;  %v575_v63 = vmax.f32 %v520_v57, 0.0  ;;  %v1449_v57 = vld [vmem:[%s1878_s5 + $0x18] sm:$0xff] }
  0xa0   : > { %977 = vmatpush.bf16.msrb.mxu0 %v1449_v57 }
  0xa3   : > { %v549_v56 = vpop.f32.mrf.mxu3 }
  0xa4   : > { %v448_v58 = vpop.f32.mrf.mxu0  ;;  %v522_v59 = vpop.f32.mrf.mxu1 }
  0xa5   : > { %v449_v60 = vadd.f32 %v448_v58, %v1665_v40  ;;  %v523_v61 = vadd.f32 %v522_v59, %v1667_v41  ;;  %v544_v59 = vadd.f32 %v543_v28, %v1667_v41 }
  0xa7   : > { %v576_v0 = vmax.f32 %v449_v60, 0.0  ;;  %v577_v1 = vmax.f32 %v523_v61, 0.0  ;;  %v473_v60 = vadd.f32 %v472_v39, %v1665_v40  ;;  %v547_v61 = vadd.f32 %v546_v42, %v1667_v41 }
  0xa9   : > { %v610_v2 = vpack.c.bf16 %v576_v0, %v574_v62  ;;  %v611_v3 = vpack.c.bf16 %v577_v1, %v575_v63  ;;  %v478_v63 = vpop.f32.mrf.mxu2  ;;  %v591_v1 = vmax.f32 %v544_v59, 0.0 }
  0xab   : > { %773 = vmatmul.bf16.gmra.mxu2 %v610_v2  ;;  %831 = vmatmul.bf16.gmra.mxu3 %v611_v3  ;;  %v552_v0 = vpop.f32.mrf.mxu3  ;;  %v592_v2 = vmax.f32 %v473_v60, 0.0  ;;  %v593_v3 = vmax.f32 %v547_v61, 0.0 }
  0xac   : > { %v451_v4 = vpop.f32.mrf.mxu0  ;;  %v525_v5 = vpop.f32.mrf.mxu1 }
  0xad   : > { %v452_v6 = vadd.f32 %v451_v4, %v1665_v40  ;;  %v526_v7 = vadd.f32 %v525_v5, %v1667_v41 }
  0xaf   : > { %v578_v12 = vmax.f32 %v452_v6, 0.0  ;;  %v579_v13 = vmax.f32 %v526_v7, 0.0  ;;  %v619_v6 = vpack.c.bf16 %v593_v3, %v591_v1  ;;  %v1448_v7 = vld [vmem:[%s1878_s5 + $0x10] sm:$0xff] }
  0xb0   : > { %978 = vmatpush.bf16.msrb.mxu0 %v1448_v7 }
  0xb4   : > { %v454_v8 = vpop.f32.mrf.mxu0  ;;  %v528_v9 = vpop.f32.mrf.mxu1 }
  0xb5   : > { %v455_v10 = vadd.f32 %v454_v8, %v1665_v40  ;;  %v529_v11 = vadd.f32 %v528_v9, %v1667_v41  ;;  %v1447_v8 = vld [vmem:[%s1878_s5 + $0x8] sm:$0xff]  ;;  %v481_v9 = vpop.f32.mrf.mxu2 }
  0xb6   : > { %979 = vmatpush.bf16.msrb.mxu0 %v1447_v8 }
  0xb7   : > { %v580_v14 = vmax.f32 %v455_v10, 0.0  ;;  %v581_v15 = vmax.f32 %v529_v11, 0.0  ;;  %v555_v10 = vpop.f32.mrf.mxu3  ;;  %v476_v11 = vadd.f32 %v475_v55, %v1665_v40 }
  0xb9   : > { %v612_v17 = vpack.c.bf16 %v580_v14, %v578_v12  ;;  %v613_v18 = vpack.c.bf16 %v581_v15, %v579_v13  ;;  %v550_v12 = vadd.f32 %v549_v56, %v1667_v41  ;;  %v479_v13 = vadd.f32 %v478_v63, %v1665_v40 }
  0xba   : > { %v553_v14 = vadd.f32 %v552_v0, %v1667_v41  ;;  %v594_v15 = vmax.f32 %v476_v11, 0.0 }
  0xbb   : > { %778 = vmatmul.bf16.gmra.mxu2 %v612_v17  ;;  %836 = vmatmul.bf16.gmra.mxu3 %v613_v18  ;;  %v595_v16 = vmax.f32 %v550_v12, 0.0  ;;  %v596_v17 = vmax.f32 %v479_v13, 0.0 }
  0xbc   : > { %v457_v19 = vpop.f32.mrf.mxu0  ;;  %v531_v20 = vpop.f32.mrf.mxu1  ;;  %v597_v18 = vmax.f32 %v553_v14, 0.0 }
  0xbd   : > { %v458_v22 = vadd.f32 %v457_v19, %v1665_v40  ;;  %v532_v23 = vadd.f32 %v531_v20, %v1667_v41  ;;  %v484_v19 = vpop.f32.mrf.mxu2  ;;  %v620_v21 = vpack.c.bf16 %v596_v17, %v594_v15 }
  0xbf   : > { %v582_v29 = vmax.f32 %v458_v22, 0.0  ;;  %v583_v30 = vmax.f32 %v532_v23, 0.0  ;;  %v558_v20 = vpop.f32.mrf.mxu3  ;;  %v621_v22 = vpack.c.bf16 %v597_v18, %v595_v16  ;;  %v482_v23 = vadd.f32 %v481_v9, %v1665_v40 }
  0xc4   : > { %v460_v24 = vpop.f32.mrf.mxu0  ;;  %v534_v25 = vpop.f32.mrf.mxu1 }
  0xc5   : > { %v461_v26 = vadd.f32 %v460_v24, %v1665_v40  ;;  %v535_v27 = vadd.f32 %v534_v25, %v1667_v41  ;;  %v556_v24 = vadd.f32 %v555_v10, %v1667_v41  ;;  %v485_v25 = vadd.f32 %v484_v19, %v1665_v40 }
  0xc7   : > { %v584_v31 = vmax.f32 %v461_v26, 0.0  ;;  %v585_v32 = vmax.f32 %v535_v27, 0.0  ;;  %v559_v26 = vadd.f32 %v558_v20, %v1667_v41  ;;  %v487_v27 = vpop.f32.mrf.mxu2  ;;  %v561_v28 = vpop.f32.mrf.mxu3 }
  0xc8   : > { %v488_v38 = vadd.f32 %v487_v27, %v1665_v40  ;;  %v562_v39 = vadd.f32 %v561_v28, %v1667_v41 }
  0xc9   : > { %v614_v33 = vpack.c.bf16 %v584_v31, %v582_v29  ;;  %v615_v34 = vpack.c.bf16 %v585_v32, %v583_v30  ;;  %v1446_v29 = vld [vmem:[%s1878_s5] sm:$0xff]  ;;  %v598_v30 = vmax.f32 %v482_v23, 0.0  ;;  %v599_v31 = vmax.f32 %v556_v24, 0.0 }
  0xca   : > { %v600_v32 = vmax.f32 %v485_v25, 0.0  ;;  %980 = vmatpush.bf16.msrb.mxu0 %v1446_v29  ;;  %v1457_v25 = vld [vmem:[%s1880_s7 + $0x18] sm:$0xff] }
  0xcb   : > { %783 = vmatmul.bf16.gmra.mxu2 %v614_v33  ;;  %841 = vmatmul.bf16.gmra.mxu3 %v615_v34  ;;  %v601_v33 = vmax.f32 %v559_v26, 0.0 }
  0xcc   : > { %v463_v36 = vpop.f32.mrf.mxu0  ;;  %v537_v37 = vpop.f32.mrf.mxu1  ;;  %v622_v35 = vpack.c.bf16 %v600_v32, %v598_v30  ;;  %1131 = vmatpush.bf16.msrb.mxu1 %v1457_v25 }
  0xcd   : > { %v464_v43 = vadd.f32 %v463_v36, %v1665_v40  ;;  %v538_v44 = vadd.f32 %v537_v37, %v1667_v41  ;;  %v623_v34 = vpack.c.bf16 %v601_v33, %v599_v31 }
  0xcf   : > { %v586_v49 = vmax.f32 %v464_v43, 0.0  ;;  %v587_v50 = vmax.f32 %v538_v44, 0.0  ;;  %v490_v36 = vpop.f32.mrf.mxu2  ;;  %v564_v37 = vpop.f32.mrf.mxu3 }
  0xd0   : > { %v491_v42 = vadd.f32 %v490_v36, %v1665_v40  ;;  %v565_v43 = vadd.f32 %v564_v37, %v1667_v41 }
  0xd4   : > { %v466_v45 = vpop.f32.mrf.mxu0  ;;  %v540_v46 = vpop.f32.mrf.mxu1 }
  0xd5   : > { %v467_v47 = vadd.f32 %v466_v45, %v1665_v40  ;;  %v541_v48 = vadd.f32 %v540_v46, %v1667_v41  ;;  %v602_v46 = vmax.f32 %v488_v38, 0.0 }
  0xd7   : > { %v588_v51 = vmax.f32 %v467_v47, 0.0  ;;  %v589_v52 = vmax.f32 %v541_v48, 0.0  ;;  %v493_v44 = vpop.f32.mrf.mxu2  ;;  %v567_v45 = vpop.f32.mrf.mxu3  ;;  %v603_v47 = vmax.f32 %v562_v39, 0.0  ;;  %v604_v48 = vmax.f32 %v491_v42, 0.0 }
  0xd8   : > { %v494_v55 = vadd.f32 %v493_v44, %v1665_v40  ;;  %v568_v56 = vadd.f32 %v567_v45, %v1667_v41 }
  0xd9   : > { %v616_v53 = vpack.c.bf16 %v588_v51, %v586_v49  ;;  %v617_v54 = vpack.c.bf16 %v589_v52, %v587_v50  ;;  %v605_v49 = vmax.f32 %v565_v43, 0.0  ;;  %v624_v50 = vpack.c.bf16 %v604_v48, %v602_v46  ;;  %v1456_v43 = vld [vmem:[%s1880_s7 + $0x10] sm:$0xff] }
  0xda   : > { %v607_v59 = vmax.f32 %v568_v56, 0.0  ;;  %1132 = vmatpush.bf16.msrb.mxu1 %v1456_v43  ;;  %v1455_v56 = vld [vmem:[%s1880_s7 + $0x8] sm:$0xff] }
  0xdb   : > { %788 = vmatmul.bf16.gmra.mxu2 %v616_v53  ;;  %846 = vmatmul.bf16.gmra.mxu3 %v617_v54  ;;  %v625_v51 = vpack.c.bf16 %v605_v49, %v603_v47  ;;  %v1732_v54 = vld [vmem:[%s1877_s4] ss:$0 sm:$0xff] }
  0xdc   : > { %v469_v58 = vpop.f32.mrf.mxu0  ;;  %v627_v1 = vpack.c.bf16 %v607_v59, %v607_v59 }
  0xdd   : > { %v470_v62 = vadd.f32 %v469_v58, %v1665_v40  ;;  %v606_v58 = vmax.f32 %v494_v55, 0.0 }
  0xde   : > { %1133 = vmatpush.bf16.msrb.mxu1 %v1455_v56 }
  0xdf   : > { %v590_v4 = vmax.f32 %v470_v62, 0.0  ;;  %v626_v0 = vpack.c.bf16 %v606_v58, %v606_v58 }
  0xe1   : > { %v618_v5 = vpack.c.bf16 %v592_v2, %v590_v4 }
  0xeb   : > { %793 = vmatmul.bf16.gmra.mxu2 %v618_v5  ;;  %851 = vmatmul.bf16.gmra.mxu3 %v619_v6 }
  0xfb   : > { %798 = vmatmul.bf16.gmra.mxu2 %v620_v21  ;;  %856 = vmatmul.bf16.gmra.mxu3 %v621_v22 }
 0x10b   : > { %803 = vmatmul.bf16.gmra.mxu2 %v622_v35  ;;  %861 = vmatmul.bf16.gmra.mxu3 %v623_v34 }
 0x11b   : > { %808 = vmatmul.bf16.gmra.mxu2 %v624_v50  ;;  %866 = vmatmul.bf16.gmra.mxu3 %v625_v51 }
 0x11e   : > { %v769_v52 = vpop.f32.mrf.mxu2  ;;  %v827_v53 = vpop.f32.mrf.mxu3 }
 0x11f   : > { %v770_v57 = vadd.f32 %v1732_v54, %v769_v52 }
 0x121   : > { %v828_v62 = vadd.f32 %v827_v53, %v770_v57 }
 0x123   : > { %v876_v3 = vmax.f32 %v828_v62, 0.0 }
 0x126   : > { %v771_v60 = vpop.f32.mrf.mxu2  ;;  %v829_v61 = vpop.f32.mrf.mxu3 }
 0x127   : > { %v772_v63 = vadd.f32 %v1732_v54, %v771_v60 }
 0x129   : > { %v830_v2 = vadd.f32 %v829_v61, %v772_v63 }
 0x12b   : > { %v877_v4 = vmax.f32 %v830_v2, 0.0  ;;  %813 = vmatmul.bf16.gmra.mxu2 %v626_v0  ;;  %871 = vmatmul.bf16.gmra.mxu3 %v627_v1 }
 0x12d   : > { %v895_v5 = vpack.c.bf16 %v877_v4, %v876_v3 }
 0x12e   : > { %v774_v40 = vpop.f32.mrf.mxu2  ;;  %v832_v6 = vpop.f32.mrf.mxu3 }
 0x12f   : > { %981 = vmatmul.bf16.vlgmr.msrb.gmra.mxu0 %v895_v5  ;;  %v775_v41 = vadd.f32 %v1732_v54, %v774_v40 }
 0x131   : > { %v833_v9 = vadd.f32 %v832_v6, %v775_v41 }
 0x133   : > { %v878_v12 = vmax.f32 %v833_v9, 0.0 }
 0x136   : > { %v776_v7 = vpop.f32.mrf.mxu2  ;;  %v834_v8 = vpop.f32.mrf.mxu3 }
 0x137   : > { %v777_v10 = vadd.f32 %v1732_v54, %v776_v7 }
 0x139   : > { %v835_v11 = vadd.f32 %v834_v8, %v777_v10  ;;  %v1454_v10 = vld [vmem:[%s1880_s7] sm:$0xff] }
 0x13a   : > { %1134 = vmatpush.bf16.msrb.mxu1 %v1454_v10 }
 0x13b   : > { %v879_v13 = vmax.f32 %v835_v11, 0.0 }
 0x13d   : > { %v896_v14 = vpack.c.bf16 %v879_v13, %v878_v12 }
 0x13e   : > { %v779_v15 = vpop.f32.mrf.mxu2  ;;  %v837_v16 = vpop.f32.mrf.mxu3 }
 0x13f   : > { %986 = vmatmul.bf16.gmra.mxu0 %v896_v14  ;;  %v780_v17 = vadd.f32 %v1732_v54, %v779_v15 }
 0x141   : > { %v838_v20 = vadd.f32 %v837_v16, %v780_v17 }
 0x143   : > { %v880_v23 = vmax.f32 %v838_v20, 0.0 }
 0x146   : > { %v781_v18 = vpop.f32.mrf.mxu2  ;;  %v839_v19 = vpop.f32.mrf.mxu3 }
 0x147   : > { %v782_v21 = vadd.f32 %v1732_v54, %v781_v18 }
 0x149   : > { %v840_v22 = vadd.f32 %v839_v19, %v782_v21 }
 0x14b   : > { %v881_v24 = vmax.f32 %v840_v22, 0.0 }
 0x14d   : > { %v897_v26 = vpack.c.bf16 %v881_v24, %v880_v23 }
 0x14e   : > { %v784_v27 = vpop.f32.mrf.mxu2  ;;  %v842_v28 = vpop.f32.mrf.mxu3 }
 0x14f   : > { %991 = vmatmul.bf16.gmra.mxu0 %v897_v26  ;;  %v785_v29 = vadd.f32 %v1732_v54, %v784_v27 }
 0x151   : > { %v843_v32 = vadd.f32 %v842_v28, %v785_v29 }
 0x153   : > { %v882_v35 = vmax.f32 %v843_v32, 0.0 }
 0x156   : > { %v786_v30 = vpop.f32.mrf.mxu2  ;;  %v844_v31 = vpop.f32.mrf.mxu3 }
 0x157   : > { %v787_v33 = vadd.f32 %v1732_v54, %v786_v30 }
 0x159   : > { %v845_v34 = vadd.f32 %v844_v31, %v787_v33 }
 0x15b   : > { %v883_v36 = vmax.f32 %v845_v34, 0.0 }
 0x15d   : > { %v898_v37 = vpack.c.bf16 %v883_v36, %v882_v35  ;;  %v1769_v36 = vld [vmem:[%s1879_s6] ss:$0 sm:$0xff] }
 0x15e   : > { %v789_v38 = vpop.f32.mrf.mxu2  ;;  %v847_v39 = vpop.f32.mrf.mxu3 }
 0x15f   : > { %996 = vmatmul.bf16.gmra.mxu0 %v898_v37  ;;  %v790_v42 = vadd.f32 %v1732_v54, %v789_v38 }
 0x161   : > { %v848_v46 = vadd.f32 %v847_v39, %v790_v42 }
 0x163   : > { %v884_v49 = vmax.f32 %v848_v46, 0.0 }
 0x166   : > { %v791_v44 = vpop.f32.mrf.mxu2  ;;  %v849_v45 = vpop.f32.mrf.mxu3 }
 0x167   : > { %v792_v47 = vadd.f32 %v1732_v54, %v791_v44 }
 0x169   : > { %v850_v48 = vadd.f32 %v849_v45, %v792_v47 }
 0x16b   : > { %v885_v50 = vmax.f32 %v850_v48, 0.0 }
 0x16d   : > { %v899_v51 = vpack.c.bf16 %v885_v50, %v884_v49 }
 0x16e   : > { %v794_v52 = vpop.f32.mrf.mxu2  ;;  %v852_v53 = vpop.f32.mrf.mxu3 }
 0x16f   : > { %1001 = vmatmul.bf16.gmra.mxu0 %v899_v51  ;;  %v795_v55 = vadd.f32 %v1732_v54, %v794_v52 }
 0x171   : > { %v853_v59 = vadd.f32 %v852_v53, %v795_v55 }
 0x173   : > { %v886_v62 = vmax.f32 %v853_v59, 0.0 }
 0x176   : > { %v796_v57 = vpop.f32.mrf.mxu2  ;;  %v854_v58 = vpop.f32.mrf.mxu3 }
 0x177   : > { %v797_v60 = vadd.f32 %v1732_v54, %v796_v57 }
 0x179   : > { %v855_v61 = vadd.f32 %v854_v58, %v797_v60 }
 0x17b   : > { %v887_v63 = vmax.f32 %v855_v61, 0.0 }
 0x17d   : > { %v900_v0 = vpack.c.bf16 %v887_v63, %v886_v62 }
 0x17e   : > { %v799_v1 = vpop.f32.mrf.mxu2  ;;  %v857_v2 = vpop.f32.mrf.mxu3 }
 0x17f   : > { %1006 = vmatmul.bf16.gmra.mxu0 %v900_v0  ;;  %v800_v3 = vadd.f32 %v1732_v54, %v799_v1 }
 0x181   : > { %v858_v40 = vadd.f32 %v857_v2, %v800_v3 }
 0x183   : > { %v888_v7 = vmax.f32 %v858_v40, 0.0 }
 0x186   : > { %v801_v4 = vpop.f32.mrf.mxu2  ;;  %v859_v5 = vpop.f32.mrf.mxu3 }
 0x187   : > { %v802_v6 = vadd.f32 %v1732_v54, %v801_v4 }
 0x189   : > { %v860_v41 = vadd.f32 %v859_v5, %v802_v6 }
 0x18b   : > { %v889_v8 = vmax.f32 %v860_v41, 0.0 }
 0x18d   : > { %v901_v9 = vpack.c.bf16 %v889_v8, %v888_v7 }
 0x18e   : > { %v804_v11 = vpop.f32.mrf.mxu2  ;;  %v862_v12 = vpop.f32.mrf.mxu3 }
 0x18f   : > { %1011 = vmatmul.bf16.gmra.mxu0 %v901_v9  ;;  %v805_v13 = vadd.f32 %v1732_v54, %v804_v11 }
 0x191   : > { %v863_v16 = vadd.f32 %v862_v12, %v805_v13 }
 0x193   : > { %v890_v19 = vmax.f32 %v863_v16, 0.0 }
 0x196   : > { %v806_v14 = vpop.f32.mrf.mxu2  ;;  %v864_v15 = vpop.f32.mrf.mxu3 }
 0x197   : > { %v807_v17 = vadd.f32 %v1732_v54, %v806_v14 }
 0x199   : > { %v865_v18 = vadd.f32 %v864_v15, %v807_v17 }
 0x19b   : > { %v891_v20 = vmax.f32 %v865_v18, 0.0 }
 0x19d   : > { %v902_v21 = vpack.c.bf16 %v891_v20, %v890_v19 }
 0x19e   : > { %v809_v22 = vpop.f32.mrf.mxu2  ;;  %v867_v23 = vpop.f32.mrf.mxu3 }
 0x19f   : > { %1016 = vmatmul.bf16.gmra.mxu0 %v902_v21  ;;  %v810_v24 = vadd.f32 %v1732_v54, %v809_v22 }
 0x1a1   : > { %v868_v27 = vadd.f32 %v867_v23, %v810_v24 }
 0x1a3   : > { %v892_v30 = vmax.f32 %v868_v27, 0.0 }
 0x1a6   : > { %v811_v25 = vpop.f32.mrf.mxu2  ;;  %v869_v26 = vpop.f32.mrf.mxu3 }
 0x1a7   : > { %v812_v28 = vadd.f32 %v1732_v54, %v811_v25 }
 0x1a9   : > { %v870_v29 = vadd.f32 %v869_v26, %v812_v28 }
 0x1ab   : > { %v893_v31 = vmax.f32 %v870_v29, 0.0 }
 0x1ac   : > { %v982_v32 = vpop.f32.mrf.mxu0 }
 0x1ad   : > { %v903_v33 = vpack.c.bf16 %v893_v31, %v892_v30  ;;  %v983_v38 = vadd.f32 %v1769_v36, %v982_v32 }
 0x1ae   : > { %v814_v34 = vpop.f32.mrf.mxu2  ;;  %v872_v35 = vpop.f32.mrf.mxu3 }
 0x1af   : > { %1021 = vmatmul.bf16.gmra.mxu0 %v903_v33  ;;  %v815_v37 = vadd.f32 %v1732_v54, %v814_v34  ;;  %v1031_v46 = vmax.f32 %v983_v38, 0.0 }
 0x1b1   : > { %v873_v42 = vadd.f32 %v872_v35, %v815_v37 }
 0x1b3   : > { %v894_v48 = vmax.f32 %v873_v42, 0.0 }
 0x1b4   : > { %v984_v39 = vpop.f32.mrf.mxu0 }
 0x1b5   : > { %v985_v43 = vadd.f32 %v1769_v36, %v984_v39  ;;  %v904_v51 = vpack.c.bf16 %v894_v48, %v894_v48  ;;  %v1801_v39 = vld [vmem:[%s1881_s8] ss:$0 sm:$0xff] }
 0x1b6   : > { %v816_v44 = vpop.f32.mrf.mxu2  ;;  %v874_v45 = vpop.f32.mrf.mxu3 }
 0x1b7   : > { %v1032_v47 = vmax.f32 %v985_v43, 0.0 }
 0x1b9   : > { %v1050_v49 = vpack.c.bf16 %v1032_v47, %v1031_v46 }
 0x1bb   : > { %1418 = vmatmul.msk.bf16.vlgmr.msrb.gmra.mxu1 %vm1096_vm1, %v1050_v49 }
 0x1bc   : > { %v987_v50 = vpop.f32.mrf.mxu0 }
 0x1bd   : > { %v988_v54 = vadd.f32 %v1769_v36, %v987_v50 }
 0x1bf   : > { %1026 = vmatmul.bf16.gmra.mxu0 %v904_v51  ;;  %v1033_v55 = vmax.f32 %v988_v54, 0.0 }
 0x1c4   : > { %v989_v52 = vpop.f32.mrf.mxu0 }
 0x1c5   : > { %v990_v53 = vadd.f32 %v1769_v36, %v989_v52 }
 0x1c7   : > { %v1034_v56 = vmax.f32 %v990_v53, 0.0 }
 0x1c9   : > { %v1051_v57 = vpack.c.bf16 %v1034_v56, %v1033_v55 }
 0x1cb   : > { %1419 = vmatmul.msk.bf16.gmra.mxu1 %vm1096_vm1, %v1051_v57 }
 0x1cc   : > { %v992_v58 = vpop.f32.mrf.mxu0 }
 0x1cd   : > { %v993_v59 = vadd.f32 %v1769_v36, %v992_v58 }
 0x1cf   : > { %v1035_v62 = vmax.f32 %v993_v59, 0.0 }
 0x1d4   : > { %v994_v60 = vpop.f32.mrf.mxu0 }
 0x1d5   : > { %v995_v61 = vadd.f32 %v1769_v36, %v994_v60 }
 0x1d7   : > { %v1036_v63 = vmax.f32 %v995_v61, 0.0 }
 0x1d9   : > { %v1052_v0 = vpack.c.bf16 %v1036_v63, %v1035_v62 }
 0x1db   : > { %1420 = vmatmul.msk.bf16.gmra.mxu1 %vm1096_vm1, %v1052_v0 }
 0x1dc   : > { %v997_v1 = vpop.f32.mrf.mxu0 }
 0x1dd   : > { %v998_v2 = vadd.f32 %v1769_v36, %v997_v1 }
 0x1df   : > { %v1037_v5 = vmax.f32 %v998_v2, 0.0 }
 0x1e4   : > { %v999_v3 = vpop.f32.mrf.mxu0 }
 0x1e5   : > { %v1000_v4 = vadd.f32 %v1769_v36, %v999_v3 }
 0x1e7   : > { %v1038_v40 = vmax.f32 %v1000_v4, 0.0 }
 0x1e9   : > { %v1053_v6 = vpack.c.bf16 %v1038_v40, %v1037_v5 }
 0x1eb   : > { %1421 = vmatmul.msk.bf16.gmra.mxu1 %vm1096_vm1, %v1053_v6 }
 0x1ec   : > { %v1002_v41 = vpop.f32.mrf.mxu0 }
 0x1ed   : > { %v1003_v7 = vadd.f32 %v1769_v36, %v1002_v41 }
 0x1ef   : > { %v1039_v10 = vmax.f32 %v1003_v7, 0.0 }
 0x1f4   : > { %v1004_v8 = vpop.f32.mrf.mxu0 }
 0x1f5   : > { %v1005_v9 = vadd.f32 %v1769_v36, %v1004_v8 }
 0x1f7   : > { %v1040_v11 = vmax.f32 %v1005_v9, 0.0 }
 0x1f9   : > { %v1054_v12 = vpack.c.bf16 %v1040_v11, %v1039_v10 }
 0x1fb   : > { %1422 = vmatmul.msk.bf16.gmra.mxu1 %vm1096_vm1, %v1054_v12 }
 0x1fc   : > { %v1007_v13 = vpop.f32.mrf.mxu0 }
 0x1fd   : > { %v1008_v14 = vadd.f32 %v1769_v36, %v1007_v13 }
 0x1ff   : > { %v1041_v17 = vmax.f32 %v1008_v14, 0.0 }
 0x204   : > { %v1009_v15 = vpop.f32.mrf.mxu0 }
 0x205   : > { %v1010_v16 = vadd.f32 %v1769_v36, %v1009_v15 }
 0x207   : > { %v1042_v18 = vmax.f32 %v1010_v16, 0.0 }
 0x209   : > { %v1055_v19 = vpack.c.bf16 %v1042_v18, %v1041_v17 }
 0x20b   : > { %1423 = vmatmul.msk.bf16.gmra.mxu1 %vm1096_vm1, %v1055_v19 }
 0x20c   : > { %v1012_v20 = vpop.f32.mrf.mxu0 }
 0x20d   : > { %v1013_v21 = vadd.f32 %v1769_v36, %v1012_v20 }
 0x20f   : > { %v1043_v24 = vmax.f32 %v1013_v21, 0.0 }
 0x214   : > { %v1014_v22 = vpop.f32.mrf.mxu0 }
 0x215   : > { %v1015_v23 = vadd.f32 %v1769_v36, %v1014_v22 }
 0x217   : > { %v1044_v25 = vmax.f32 %v1015_v23, 0.0 }
 0x219   : > { %v1056_v26 = vpack.c.bf16 %v1044_v25, %v1043_v24 }
 0x21b   : > { %1424 = vmatmul.msk.bf16.gmra.mxu1 %vm1096_vm1, %v1056_v26 }
 0x21c   : > { %v1017_v27 = vpop.f32.mrf.mxu0 }
 0x21d   : > { %v1018_v28 = vadd.f32 %v1769_v36, %v1017_v27 }
 0x21f   : > { %v1045_v31 = vmax.f32 %v1018_v28, 0.0 }
 0x224   : > { %v1019_v29 = vpop.f32.mrf.mxu0 }
 0x225   : > { %v1020_v30 = vadd.f32 %v1769_v36, %v1019_v29 }
 0x227   : > { %v1046_v32 = vmax.f32 %v1020_v30, 0.0 }
 0x229   : > { %v1057_v33 = vpack.c.bf16 %v1046_v32, %v1045_v31 }
 0x22b   : > { %1425 = vmatmul.msk.bf16.gmra.mxu1 %vm1096_vm1, %v1057_v33 }
 0x22c   : > { %v1022_v34 = vpop.f32.mrf.mxu0 }
 0x22d   : > { %v1023_v35 = vadd.f32 %v1769_v36, %v1022_v34 }
 0x22f   : > { %v1047_v42 = vmax.f32 %v1023_v35, 0.0 }
 0x234   : > { %v1024_v37 = vpop.f32.mrf.mxu0 }
 0x235   : > { %v1025_v38 = vadd.f32 %v1769_v36, %v1024_v37 }
 0x237   : > { %v1048_v43 = vmax.f32 %v1025_v38, 0.0 }
 0x238   : > { %v1136_v44 = vpop.f32.mrf.mxu1 }
 0x239   : > { %v1058_v45 = vpack.c.bf16 %v1048_v43, %v1047_v42  ;;  %v1137_v46 = vadd.f32 %v1801_v39, %v1136_v44 }
 0x23b   : > { %1186 = vst.msk [vmem:[%s1808_s13] sm:$0xff] %vm1185_vm2, %v1137_v46  ;;  %1426 = vmatmul.msk.bf16.gmra.mxu1 %vm1096_vm1, %v1058_v45 }
 0x23c   : > { %v1027_v47 = vpop.f32.mrf.mxu0 }
 0x23d   : > { %v1028_v49 = vadd.f32 %v1769_v36, %v1027_v47 }
 0x23f   : > { %v1049_v54 = vmax.f32 %v1028_v49, 0.0 }
 0x240   : > { %v1138_v48 = vpop.f32.mrf.mxu1 }
 0x241   : > { %v1139_v50 = vadd.f32 %v1801_v39, %v1138_v48  ;;  %v1059_v53 = vpack.c.bf16 %v1049_v54, %v1049_v54 }
 0x243   : > { %1187 = vst.msk [vmem:[%s1808_s13 + $0x8] sm:$0xff] %vm1185_vm2, %v1139_v50 }
 0x244   : > { %v1029_v51 = vpop.f32.mrf.mxu0 }
 0x248   : > { %v1141_v52 = vpop.f32.mrf.mxu1 }
 0x249   : > { %v1142_v55 = vadd.f32 %v1801_v39, %v1141_v52 }
 0x24b   : > { %1188 = vst.msk [vmem:[%s1808_s13 + $0x10] sm:$0xff] %vm1185_vm2, %v1142_v55  ;;  %1427 = vmatmul.msk.bf16.gmra.mxu1 %vm1096_vm1, %v1059_v53 }
 0x250   : > { %v1143_v56 = vpop.f32.mrf.mxu1 }
 0x251   : > { %v1144_v36 = vadd.f32 %v1801_v39, %v1143_v56 }
 0x253   : > { %1189 = vst.msk [vmem:[%s1808_s13 + $0x18] sm:$0xff] %vm1185_vm2, %v1144_v36 }
 0x258   : > { %v1146_v57 = vpop.f32.mrf.mxu1 }
 0x259   : > { %v1147_v58 = vadd.f32 %v1801_v39, %v1146_v57 }
 0x25b   : > { %1190 = vst.msk [vmem:[%s1808_s13 + $0x20] sm:$0xff] %vm1185_vm2, %v1147_v58 }
 0x260   : > { %v1148_v59 = vpop.f32.mrf.mxu1 }
 0x261   : > { %v1149_v60 = vadd.f32 %v1801_v39, %v1148_v59 }
 0x263   : > { %1191 = vst.msk [vmem:[%s1808_s13 + $0x28] sm:$0xff] %vm1185_vm2, %v1149_v60 }
 0x268   : > { %v1151_v61 = vpop.f32.mrf.mxu1 }
 0x269   : > { %v1152_v62 = vadd.f32 %v1801_v39, %v1151_v61 }
 0x26b   : > { %1192 = vst.msk [vmem:[%s1808_s13 + $0x30] sm:$0xff] %vm1185_vm2, %v1152_v62 }
 0x270   : > { %v1153_v63 = vpop.f32.mrf.mxu1 }
 0x271   : > { %v1154_v0 = vadd.f32 %v1801_v39, %v1153_v63 }
 0x273   : > { %1193 = vst.msk [vmem:[%s1808_s13 + $0x38] sm:$0xff] %vm1185_vm2, %v1154_v0 }
 0x278   : > { %v1156_v1 = vpop.f32.mrf.mxu1 }
 0x279   : > { %v1157_v2 = vadd.f32 %v1801_v39, %v1156_v1 }
 0x27b   : > { %1194 = vst.msk [vmem:[%s1808_s13 + $0x40] sm:$0xff] %vm1185_vm2, %v1157_v2 }
 0x280   : > { %v1158_v3 = vpop.f32.mrf.mxu1 }
 0x281   : > { %v1159_v4 = vadd.f32 %v1801_v39, %v1158_v3 }
 0x283   : > { %1195 = vst.msk [vmem:[%s1808_s13 + $0x48] sm:$0xff] %vm1185_vm2, %v1159_v4 }
 0x288   : > { %v1161_v5 = vpop.f32.mrf.mxu1 }
 0x289   : > { %v1162_v40 = vadd.f32 %v1801_v39, %v1161_v5 }
 0x28b   : > { %1196 = vst.msk [vmem:[%s1808_s13 + $0x50] sm:$0xff] %vm1185_vm2, %v1162_v40 }
 0x290   : > { %v1163_v6 = vpop.f32.mrf.mxu1 }
 0x291   : > { %v1164_v41 = vadd.f32 %v1801_v39, %v1163_v6 }
 0x293   : > { %1197 = vst.msk [vmem:[%s1808_s13 + $0x58] sm:$0xff] %vm1185_vm2, %v1164_v41 }
 0x298   : > { %v1166_v7 = vpop.f32.mrf.mxu1 }
 0x299   : > { %v1167_v8 = vadd.f32 %v1801_v39, %v1166_v7 }
 0x29b   : > { %1198 = vst.msk [vmem:[%s1808_s13 + $0x60] sm:$0xff] %vm1185_vm2, %v1167_v8 }
 0x2a0   : > { %v1168_v9 = vpop.f32.mrf.mxu1 }
 0x2a1   : > { %v1169_v10 = vadd.f32 %v1801_v39, %v1168_v9 }
 0x2a3   : > { %1199 = vst.msk [vmem:[%s1808_s13 + $0x68] sm:$0xff] %vm1185_vm2, %v1169_v10 }
 0x2a8   : > { %v1171_v11 = vpop.f32.mrf.mxu1 }
 0x2a9   : > { %v1172_v12 = vadd.f32 %v1801_v39, %v1171_v11 }
 0x2ab   : > { %1200 = vst.msk [vmem:[%s1808_s13 + $0x70] sm:$0xff] %vm1185_vm2, %v1172_v12 }
 0x2b0   : > { %v1173_v13 = vpop.f32.mrf.mxu1 }
 0x2b1   : > { %v1174_v14 = vadd.f32 %v1801_v39, %v1173_v13 }
 0x2b3   : > { %1201 = vst.msk [vmem:[%s1808_s13 + $0x78] sm:$0xff] %vm1185_vm2, %v1174_v14 }
 0x2b8   : > { %v1176_v15 = vpop.f32.mrf.mxu1 }
 0x2b9   : > { %v1177_v16 = vadd.f32 %v1801_v39, %v1176_v15 }
 0x2bb   : > { %1202 = vst.msk [vmem:[%s1808_s13 + $0x80] sm:$0xff] %vm1185_vm2, %v1177_v16 }
 0x2c0   : > { %v1178_v17 = vpop.f32.mrf.mxu1 }
 0x2c1   : > { %v1179_v18 = vadd.f32 %v1801_v39, %v1178_v17 }
 0x2c3   : > { %1203 = vst.msk [vmem:[%s1808_s13 + $0x88] sm:$0xff] %vm1185_vm2, %v1179_v18 }
 0x2c8   : > { %v1181_v19 = vpop.f32.mrf.mxu1 }
 0x2c9   : > { %v1182_v20 = vadd.f32 %v1801_v39, %v1181_v19 }
 0x2cb   : > { %1204 = vst.msk [vmem:[%s1808_s13 + $0x90] sm:$0xff] %vm1185_vm2, %v1182_v20 }
 0x2d0   : > { %v1183_v21 = vpop.f32.mrf.mxu1 }
 0x2d1 PF: > { %s19_s30 = sadd.s32 1, %s1477_s30  }
 0x2d2   : > { %p16_p4 = scmp.ge.s32.totalorder %s19_s30, 4  }
 0x2d4   :  { %18 = sbr.rel (!%p16_p4) target bundleno = 1 (0x1), region = 86 }

</bundles_post_ra>
